<compile_context>
chip_gen: v7x
topology: tpu7x:2x2x1
jax: 0.10.0
libtpu: 0.0.40
codegen_flags: <defaults>
</compile_context>

<pallas_src>
import jax
import jax.numpy as jnp
from jax.experimental import pallas as pl
from jax.experimental.pallas import tpu as pltpu

_LANE = 128                    # lane width (last-dim alignment unit)
_SLAB_WIDTH = 1024             # preferred lane-dense slab width for the flat path
_TILE_BYTES = 4 * 1024 * 1024  # per-input-block budget; in+out double-buffered ~16 MiB
_VMEM_LIMIT = 48 * 1024 * 1024 # < 64 MiB physical VMEM on v7x, well under v5e/v6e
_ROW_BLOCKS_TARGET = 4         # keep >= ~4 row blocks so both v7x TCs stay busy


def _round_down(v: int, m: int) -> int:
    return (v // m) * m


def _round_up(v: int, m: int) -> int:
    return -(-v // m) * m


def _not_gate_kernel(x_ref, o_ref):
    x = x_ref[...]
    one = jnp.asarray(1, dtype=o_ref.dtype)
    # +1 where x < 0, -1 otherwise (NaN / -0.0 fall to -1, matching PyTorch).
    # NOTE: expects signed/float dtypes; for unsigned ints "-1" would wrap.
    o_ref[...] = jnp.where(x < 0, one, -one)


def _launch_2d(x2: jax.Array) -> jax.Array:
    """Run the elementwise kernel over an arbitrary 2-D array, no layout copies."""
    R, C = x2.shape
    itemsize = jnp.dtype(x2.dtype).itemsize
    # Sublane multiple: 8 for 4-byte, 16 for 2-byte, 32 for 1-byte dtypes.
    sub = max(8, 32 // itemsize)

    # --- tile width (last dim): full C when it fits, else a 128-multiple ---
    if C < _LANE or C * itemsize * sub <= _TILE_BYTES:
        tile_c = C
    else:
        tile_c = max(_LANE, _round_down(_TILE_BYTES // (sub * itemsize), _LANE))
        tile_c = min(tile_c, max(_LANE, _round_down(C, _LANE)))

    # --- tile rows: byte budget, capped so the grid has >= ~4 row blocks ---
    budget_r = max(sub, _round_down(_TILE_BYTES // (tile_c * itemsize), sub))
    cap_r = max(sub, _round_up(pl.cdiv(R, _ROW_BLOCKS_TARGET), sub))
    tile_r = min(budget_r, cap_r)
    if tile_r >= R:
        tile_r = R  # single row block: the full array dim is always legal

    grid = (pl.cdiv(R, tile_r), pl.cdiv(C, tile_c))
    return pl.pallas_call(
        _not_gate_kernel,
        out_shape=jax.ShapeDtypeStruct((R, C), x2.dtype),
        grid_spec=pl.GridSpec(
            grid=grid,
            in_specs=[pl.BlockSpec((tile_r, tile_c), lambda i, j: (i, j))],
            out_specs=pl.BlockSpec((tile_r, tile_c), lambda i, j: (i, j)),
        ),
        compiler_params=pltpu.CompilerParams(
            dimension_semantics=("parallel", "parallel"),
            vmem_limit_bytes=_VMEM_LIMIT,
        ),
        cost_estimate=pl.CostEstimate(
            flops=R * C,
            transcendentals=0,
            bytes_accessed=2 * R * C * itemsize,
        ),
    )(x2)


def not_gate(x: jax.Array) -> jax.Array:
    """NOT_Gate forward. x must be rank-2 [batch, in_features]."""
    if x.ndim != 2:
        raise Exception(
            "Gates layers only accept rank-2 tensor. The shape should be "
            "[batch, gate_count * input_count]."
        )
    batch, feats = x.shape
    n = batch * feats
    if n == 0:
        return jnp.zeros_like(x)

    if feats % _LANE == 0 or n % _LANE != 0:
        # Direct 2-D path, zero layout work:
        #  - feats % 128 == 0: already lane-dense, tile in place.
        #  - ragged total size: no lane-dense reshape exists without a pad
        #    copy, so tile in place; only boundary blocks use masked stores.
        return _launch_2d(x)

    # n % 128 == 0 but feats isn't: a contiguous reshape to a lane-dense slab
    # is free (no pad / no trailing slice since the width divides n exactly).
    width = _SLAB_WIDTH
    while n % width != 0:
        width //= 2  # 1024 -> 512 -> 256 -> 128 (n % 128 == 0 guarantees halt)
    out = _launch_2d(x.reshape(n // width, width))
    return out.reshape(batch, feats)


# TODO(synk): backward (NOT_Gate_Function.backward: grad_in * -1) and the
# requires_grad/ctx bookkeeping are training-only and not part of this
# forward-pass kernel.


if __name__ == "__main__":
    key = jax.random.PRNGKey(0)

    # Primary shape per the module docs: [batch, gate_count * input_count].
    x = jax.random.normal(key, (8, 32), dtype=jnp.float32)
    out = jax.block_until_ready(not_gate(x))
    ref = jnp.where(x < 0.0, 1.0, -1.0).astype(x.dtype)
    assert out.shape == x.shape and out.dtype == x.dtype
    assert bool(jnp.all(out == ref))

    # Exercise the other layout paths:
    #  (16, 256) f32 : lane-dense direct 2-D, multi-block row grid
    #  (20, 200) f32 : ragged direct 2-D, partial boundary row block
    #  (8, 384) bf16 : lane-dense direct 2-D, packed dtype (sub = 16)
    for shape, dtype in (((16, 256), jnp.float32),
                         ((20, 200), jnp.float32),
                         ((8, 384), jnp.bfloat16)):
        key, sub_key = jax.random.split(key)
        xi = jax.random.normal(sub_key, shape, dtype=dtype)
        oi = jax.block_until_ready(not_gate(xi))
        refi = jnp.where(xi < 0, 1, -1).astype(dtype)
        assert oi.shape == xi.shape and oi.dtype == xi.dtype
        assert bool(jnp.all(oi == refi))

    print("KERNEL_OK")
</pallas_src>

<mosaic_0001>
module attributes {stable_mosaic.version = 11 : i64} {
  func.func @_not_gate_kernel(%arg0: i32, %arg1: i32, %arg2: memref<1x256xf32, #tpu.memory_space<vmem>>, %arg3: memref<1x256xf32, #tpu.memory_space<vmem>>) attributes {dimension_semantics = [#tpu.dimension_semantics<parallel>, #tpu.dimension_semantics<parallel>], iteration_bounds = array<i64: 1, 1>, scalar_prefetch = 0 : i64, scratch_operands = 0 : i64, tpu.core_type = #tpu.core_type<tc>, window_params = [{transform_indices = @transform_0, window_bounds = array<i64: 1, 256>}, {transform_indices = @transform_1, window_bounds = array<i64: 1, 256>}]} {
    %c0 = arith.constant 0 : index
    %c0_0 = arith.constant 0 : index
    %0 = vector.load %arg2[%c0, %c0_0] : memref<1x256xf32, #tpu.memory_space<vmem>>, vector<1x256xf32>
    %cst = arith.constant 0.000000e+00 : f32
    %1 = vector.broadcast %cst : f32 to vector<1x256xf32>
    %2 = arith.cmpf olt, %0, %1 : vector<1x256xf32>
    %cst_1 = arith.constant 0.000000e+00 : f32
    %cst_2 = arith.constant 1.000000e+00 : f32
    %3 = arith.subf %cst_1, %cst_2 : f32
    %cst_3 = arith.constant 1.000000e+00 : f32
    %4 = vector.broadcast %cst_3 : f32 to vector<1x256xf32>
    %5 = vector.broadcast %3 : f32 to vector<1x256xf32>
    %6 = arith.select %2, %4, %5 : vector<1x256xi1>, vector<1x256xf32>
    %c0_4 = arith.constant 0 : index
    %c0_5 = arith.constant 0 : index
    %7 = vector.load %arg3[%c0_4, %c0_5] : memref<1x256xf32, #tpu.memory_space<vmem>>, vector<1x256xf32>
    tpu.vector_store %arg3[%c0_4, %c0_5], %6 {strides = array<i32>} : memref<1x256xf32, #tpu.memory_space<vmem>>, vector<1x256xf32>,
    return
  }
  func.func @transform_0(%arg0: i32, %arg1: i32) -> (i32, i32) {
    %c0_i32 = arith.constant 0 : i32
    return %arg0, %arg1 : i32, i32
  }
  func.func @transform_1(%arg0: i32, %arg1: i32) -> (i32, i32) {
    %c0_i32 = arith.constant 0 : i32
    return %arg0, %arg1 : i32, i32
  }
}

</mosaic_0001>

<bundles_post_ra>
// kernel: tpu_custom_call.1
= control target key start
LH: loop header
LB: loop body
LE: loop exit
PB: predicated region body
PF: predicated region fallthrough
CT: control target
= control target key end

     0   :  { %6 = vsyncpa [#allocation3], 0  ;;  %s132_s0 = inlined_call_operand.hbm [shape: f32[1,256], index: 0, kind: input, shape index: {}]   ;;  %s133_s1 = inlined_call_operand.hbm [shape: f32[1,256], index: 1, kind: output, shape index: {}]  }
   0x1   :  { %7 = vsyncpa [#allocation4], 0  ;;  %s95_s6 = smov [#allocation2]   ;;  %s47_s10 = scalar_lea.hbm %s132_s0, 32 }
   0x2   :  { %s14_s7 = sshll.u32 %s95_s6, 4  ;;  %p48_p0 = scmp.ne.s32.totalorder %s132_s0, %s47_s10  ;;  %s15_s7 = int_to_ptr.vmem [resolvable:$true] %s14_s7 }
   0x3   :  { %p51_p1 = scmp.lt.u32.totalorder %s47_s10, %s132_s0 }
   0x5   :  { %p53_p2 = pnand %p51_p1, %p48_p0 }
   0x7   :  { %56 = shalt.err (!%p53_p2)
}
   0x8   :  { %s57_s15 = scalar_lea.vmem %s15_s7, 32  ;;  %p62_p4 = scmp.lt.s32.totalorder %s15_s7, %s15_s7 }
   0x9   :  { %p58_p3 = scmp.ne.s32.totalorder %s15_s7, %s57_s15  ;;  %p63_p5 = scmp.lt.s32.totalorder %s57_s15, %s57_s15 }
   0xb   :  { %p64_p6 = por %p63_p5, %p62_p4 }
   0xd   :  { %p65_p7 = pnand %p64_p6, %p58_p3 }
   0xf   :  { %68 = shalt.err (!%p65_p7)
}
  0x10   :  { %17 = dma.hbm_to_vmem [thread:$0]  %s132_s0, 32, %s15_s7, [#allocation3]  }
  0x11   :  { %91 = dma.done.wait [#allocation3], 32  }
  0x12   :  { %92 = vsyncadd [#allocation3], 4294967264  ;;  %v24_v0 = vlaneseq  ;;  %s96_s18 = smov [#allocation5]   ;;  %v21_v1 = vld [vmem:[#allocation2] sm:$0x3]  ;;  %v97_v2 = vmov -1.0  }
  0x13   :  { %s35_s19 = sshll.u32 %s96_s18, 4  ;;  %vm22_vm1 = vcmp.lt.f32.partialorder %v21_v1, 0.0  ;;  %s36_s19 = int_to_ptr.vmem [resolvable:$true] %s35_s19 }
  0x14   :  { %vm26_vm0 = vcmp.lt.s32.totalorder %v24_v0, 256  ;;  %v23_v3 = vsel %vm22_vm1, 1.0, %v97_v2  ;;  %s69_s20 = scalar_lea.vmem %s36_s19, 32  ;;  %p74_p9 = scmp.lt.s32.totalorder %s36_s19, %s36_s19 }
  0x15   :  { %28 = vst.msk [vmem:[#allocation5] sm:$0x3] %vm26_vm0, %v23_v3  ;;  %p70_p8 = scmp.ne.s32.totalorder %s36_s19, %s69_s20  ;;  %p75_p10 = scmp.lt.s32.totalorder %s69_s20, %s69_s20 }
  0x17   :  { %p76_p11 = por %p75_p10, %p74_p9 }
  0x19   :  { %p77_p12 = pnand %p76_p11, %p70_p8 }
  0x1b   :  { %80 = shalt.err (!%p77_p12)
}
  0x1c   :  { %s81_s22 = scalar_lea.hbm %s133_s1, 32 }
  0x1d   :  { %p82_p13 = scmp.ne.s32.totalorder %s133_s1, %s81_s22  ;;  %p85_p0 = scmp.lt.u32.totalorder %s81_s22, %s133_s1 }
  0x1f   :  { %p87_p1 = pnand %p85_p0, %p82_p13 }
  0x21   :  { %90 = shalt.err (!%p87_p1)
}
  0x22   :  { %38 = dma.vmem_to_hbm [thread:$0]  %s36_s19, 32, %s133_s1, [#allocation4]  }
  0x23   :  { %93 = dma.done.wait [#allocation4], 32  }
  0x24   :  { %94 = vsyncadd [#allocation4], 4294967264 }
  0x25   :  { %42 = vsyncpa [#allocation3], 1 }
  0x26   :  { %43 = vsyncpa [#allocation4], 1 }

</bundles_post_ra>
